<compile_context>
chip_gen: v7x
topology: tpu7x:2x2x1
jax: 0.10.0
libtpu: 0.0.40
codegen_flags: <defaults>
</compile_context>

<pallas_src>
import functools

import jax
import jax.numpy as jnp
from jax.experimental import pallas as pl
from jax.experimental.pallas import tpu as pltpu  # noqa: F401  (TPU backend)


# ----------------------------------------------------------------------------
# Kernel 1: once-per-sequence precompute (query-independent projections)
# ----------------------------------------------------------------------------
def _precompute_kernel(enc_ref, sty_ref, wkv1_ref, stylew_ref, styleb_ref,
                       wkv2_ref, kvp1_ref, sft_ref, kvp2_ref):
    """kvp1 = enc_outs @ w_kv1
       sft  = style_features @ style_w + style_b
       kvp2 = sft @ w_kv2
    """
    B1, S1, D = enc_ref.shape
    B2, S2, D2 = sty_ref.shape

    kvp1_ref[...] = jnp.dot(
        enc_ref[...].reshape(B1 * S1, D), wkv1_ref[...],
        preferred_element_type=jnp.float32).reshape(B1, S1, D)

    sft = (jnp.dot(sty_ref[...].reshape(B2 * S2, D2), stylew_ref[...],
                   preferred_element_type=jnp.float32) + styleb_ref[...])
    sft_ref[...] = sft.reshape(B2, S2, D2)
    kvp2_ref[...] = jnp.dot(sft, wkv2_ref[...],
                            preferred_element_type=jnp.float32).reshape(B2, S2, D2)


# ----------------------------------------------------------------------------
# Kernel 2: fused decoder step (both attentions + rnn-input linear + LSTM)
# ----------------------------------------------------------------------------
def _decoder_step_kernel(emb_ref, h0_ref, c0_ref,
                         enc_ref, kvp1_ref, mask_ref,
                         sft_ref, kvp2_ref,
                         wq12_ref, bq12_ref, v1_ref, v2_ref,
                         linw_e_ref, linw_c1_ref, linw_c2_ref, linb_ref,
                         *rest, nlayers):
    lstm_refs = rest[:3 * nlayers]
    out_ref, h_out_ref, c_out_ref, aw_ref = rest[3 * nlayers:]

    H = h0_ref.shape[2]
    S1, D = enc_ref.shape[1], enc_ref.shape[2]

    query = h0_ref[nlayers - 1]                                             # (B, H)

    # --- fused query projection for both attentions (lane-dense, width 2D) --
    # attention biases and q_linear are folded into wq12/bq12 at prep time.
    qp = jnp.dot(query, wq12_ref[...],
                 preferred_element_type=jnp.float32) + bq12_ref[...]        # (B, 2D)
    qp1 = qp[:, :D]                                                         # (B, D)
    qp2 = qp[:, D:]                                                         # (B, D)

    # --- attention 1 over encoder outputs -----------------------------------
    energy1 = jnp.tanh(qp1[:, None, :] + kvp1_ref[...])                     # (B, S1, D)
    e1 = jnp.sum(energy1 * v1_ref[...], axis=2)                             # (B, S1)
    e1 = jnp.where(mask_ref[...] > 0.5, jnp.float32(-1e12), e1)             # masked_fill_
    m1 = jnp.max(e1, axis=1, keepdims=True)
    p1 = jnp.exp(e1 - m1)
    wts1 = p1 * pl.reciprocal(jnp.sum(p1, axis=1, keepdims=True),
                              approx=True)                                  # softmax(dim=1)
    ctx1 = jnp.sum(wts1[:, :, None] * enc_ref[...], axis=1)                 # (B, D)

    # --- attention 2 over style features (style_mask is all-False) ----------
    energy2 = jnp.tanh(qp2[:, None, :] + kvp2_ref[...])                     # (B, S2, D)
    e2 = jnp.sum(energy2 * v2_ref[...], axis=2)                             # (B, S2)
    m2 = jnp.max(e2, axis=1, keepdims=True)
    p2 = jnp.exp(e2 - m2)
    wts2 = p2 * pl.reciprocal(jnp.sum(p2, axis=1, keepdims=True), approx=True)
    ctx2 = jnp.sum(wts2[:, :, None] * sft_ref[...], axis=1)                 # (B, D)

    # --- rnn input projection: Linear(E + 2D, 256) + Tanh -------------------
    # Row-split weights avoid materializing the (B, E+2D) concat in VMEM.
    x = jnp.tanh(
        jnp.dot(emb_ref[...], linw_e_ref[...], preferred_element_type=jnp.float32)
        + jnp.dot(ctx1, linw_c1_ref[...], preferred_element_type=jnp.float32)
        + jnp.dot(ctx2, linw_c2_ref[...], preferred_element_type=jnp.float32)
        + linb_ref[...])                                                    # (B, 256)

    # --- LSTM (seq_len == 1), concat-free: x @ W_ih + h @ W_hh + b ----------
    layer_in = x
    for l in range(nlayers):
        w_ih_ref, w_hh_ref, b_ref = (lstm_refs[3 * l], lstm_refs[3 * l + 1],
                                     lstm_refs[3 * l + 2])
        gates = (jnp.dot(layer_in, w_ih_ref[...], preferred_element_type=jnp.float32)
                 + jnp.dot(h0_ref[l], w_hh_ref[...], preferred_element_type=jnp.float32)
                 + b_ref[...])                                              # (B, 4H)
        i = jax.nn.sigmoid(gates[:, 0:H])
        f = jax.nn.sigmoid(gates[:, H:2 * H])
        g = jnp.tanh(gates[:, 2 * H:3 * H])
        o = jax.nn.sigmoid(gates[:, 3 * H:4 * H])
        c_new = f * c0_ref[l] + i * g
        h_new = o * jnp.tanh(c_new)
        h_out_ref[l] = h_new
        c_out_ref[l] = c_new
        layer_in = h_new                                                    # inter-layer dropout = identity

    out_ref[...] = layer_in                                                 # (B, H)
    aw_ref[...] = wts1                                                      # (B, S1)


# ----------------------------------------------------------------------------
# Wrappers
# ----------------------------------------------------------------------------
def decoder_precompute(params, enc_outs, style_features):
    """Query-independent projections; run once per sequence in a decode loop."""
    B, S1, D = enc_outs.shape
    S2 = style_features.shape[1]
    return pl.pallas_call(
        _precompute_kernel,
        out_shape=(jax.ShapeDtypeStruct((B, S1, D), jnp.float32),
                   jax.ShapeDtypeStruct((B, S2, D), jnp.float32),
                   jax.ShapeDtypeStruct((B, S2, D), jnp.float32)),
    )(enc_outs, style_features, params["attn1"]["w_kv"], params["style_w"],
      params["style_b"], params["attn2"]["w_kv"])


def fold_step_params(params, E, D):
    """One-time parameter prep: q_linear fold, fused query weights, lin-weight
    row split, LSTM bias merge."""
    a1, a2 = params["attn1"], params["attn2"]
    wq2 = params["q_w"] @ a2["w_q"]
    bq2 = params["q_b"] @ a2["w_q"] + a2["b"]
    lin_w = params["lin_w"]
    return {
        "wq12": jnp.concatenate([a1["w_q"], wq2], axis=1),     # (H, 2D) lane-dense
        "bq12": jnp.concatenate([a1["b"], bq2], axis=1),       # (1, 2D)
        "v1": a1["v"], "v2": a2["v"],
        "linw_e": lin_w[:E],
        "linw_c1": lin_w[E:E + D],
        "linw_c2": lin_w[E + D:],
        "linb": params["lin_b"],
        # TODO(synk): optionally cast these weights to bfloat16 on v6e/v7x to halve
        # weight DMA; kept f32 here to stay bit-tight with the PyTorch reference.
        "lstm": [{
            "w_ih": lp["w_ih"],
            "w_hh": lp["w_hh"],
            "b": lp["b_ih"] + lp["b_hh"],
        } for lp in params["lstm"]],
    }


def decoder_step(step_params, input_embeds, last_state, enc_outs, attention_mask,
                 kvp1, sft, kvp2):
    h0, c0 = last_state
    nlayers, B, H = h0.shape
    S1 = enc_outs.shape[1]
    E = input_embeds.shape[2]

    args = [input_embeds.reshape(B, E), h0, c0,
            enc_outs, kvp1, attention_mask.astype(jnp.float32),
            sft, kvp2,
            step_params["wq12"], step_params["bq12"],
            step_params["v1"], step_params["v2"],
            step_params["linw_e"], step_params["linw_c1"], step_params["linw_c2"],
            step_params["linb"]]
    for lp in step_params["lstm"]:
        args += [lp["w_ih"], lp["w_hh"], lp["b"]]

    out, h1, c1, aw = pl.pallas_call(
        functools.partial(_decoder_step_kernel, nlayers=nlayers),
        out_shape=(jax.ShapeDtypeStruct((B, H), jnp.float32),
                   jax.ShapeDtypeStruct((nlayers, B, H), jnp.float32),
                   jax.ShapeDtypeStruct((nlayers, B, H), jnp.float32),
                   jax.ShapeDtypeStruct((B, S1), jnp.float32)),
    )(*args)
    return out, (h1, c1), aw.reshape(B, 1, S1)


def decoder_forward(params, input_embeds, last_state, enc_outs, attention_mask,
                    style_features):
    """Matches Decoder.forward. In a real decode loop, decoder_precompute and
    fold_step_params run once and only decoder_step runs per token."""
    kvp1, sft, kvp2 = decoder_precompute(params, enc_outs, style_features)
    step_params = fold_step_params(params, input_embeds.shape[2], enc_outs.shape[2])
    return decoder_step(step_params, input_embeds, last_state, enc_outs,
                        attention_mask, kvp1, sft, kvp2)


# ----------------------------------------------------------------------------
# Pure-JAX reference (mirrors the PyTorch module, unfused params)
# ----------------------------------------------------------------------------
def reference_forward(params, input_embeds, last_state, enc_outs, attention_mask,
                      style_features):
    def attn_ref(q, kv, mask_bool, p):
        qp = q[:, 0, :] @ p["w_q"]
        kvp = jnp.einsum("bsd,de->bse", kv, p["w_kv"])
        energy = jnp.tanh(qp[:, None, :] + kvp + p["b"])
        e = jnp.sum(energy * p["v"], axis=2)
        e = jnp.where(mask_bool, -1e12, e)
        w = jax.nn.softmax(e, axis=1)
        return jnp.einsum("bs,bsd->bd", w, kv)[:, None, :], w[:, None, :]

    h0, c0 = last_state
    B = input_embeds.shape[0]
    query = jnp.transpose(h0[-1:], (1, 0, 2))
    context, attn_weights = attn_ref(query, enc_outs, attention_mask, params["attn1"])
    sf_trans = style_features @ params["style_w"] + params["style_b"]
    q_trans = (query[:, 0, :] @ params["q_w"] + params["q_b"])[:, None, :]
    style_mask = jnp.zeros((B, style_features.shape[1]), bool)
    style_context, _ = attn_ref(q_trans, sf_trans, style_mask, params["attn2"])
    rnn_input = jnp.concatenate([input_embeds, context, style_context], axis=2)
    x = jnp.tanh(rnn_input.reshape(B, -1) @ params["lin_w"] + params["lin_b"])
    h_list, c_list = [], []
    layer_in = x
    for l, lp in enumerate(params["lstm"]):
        H = h0.shape[2]
        gates = (layer_in @ lp["w_ih"] + h0[l] @ lp["w_hh"] + lp["b_ih"] + lp["b_hh"])
        i = jax.nn.sigmoid(gates[:, 0:H])
        f = jax.nn.sigmoid(gates[:, H:2 * H])
        g = jnp.tanh(gates[:, 2 * H:3 * H])
        o = jax.nn.sigmoid(gates[:, 3 * H:4 * H])
        c_new = f * c0[l] + i * g
        h_new = o * jnp.tanh(c_new)
        h_list.append(h_new)
        c_list.append(c_new)
        layer_in = h_new
    return layer_in, (jnp.stack(h_list), jnp.stack(c_list)), attn_weights


# ----------------------------------------------------------------------------
# Deterministic parameter init (synthetic; PyTorch-layout-equivalent)
# ----------------------------------------------------------------------------
def init_params(key, H, D, E, nlayers):
    def lin(k, fan_in, fan_out):
        kw, kb = jax.random.split(k)
        w = jax.random.normal(kw, (fan_in, fan_out), jnp.float32) / jnp.sqrt(float(fan_in))
        b = 0.01 * jax.random.normal(kb, (1, fan_out), jnp.float32)
        return w, b

    def attn_params(k):
        k1, k2 = jax.random.split(k)
        w, b = lin(k1, H + D, D)        # nn.Linear(query_size + value_size, value_size)
        v = (1.0 / jnp.sqrt(float(D))) * jax.random.normal(k2, (1, D), jnp.float32)
        return {"w_q": w[:H], "w_kv": w[H:], "b": b, "v": v}

    ks = jax.random.split(key, 6 + nlayers)
    params = {
        "attn1": attn_params(ks[0]),
        "attn2": attn_params(ks[1]),
    }
    params["q_w"], params["q_b"] = lin(ks[2], H, H)
    params["style_w"], params["style_b"] = lin(ks[3], D, D)
    params["lin_w"], params["lin_b"] = lin(ks[4], E + 2 * D, 256)   # hardcoded 256 as in module
    lstm = []
    for l in range(nlayers):
        in_size = E if l == 0 else H     # config.embedding_size must be 256 (== linear out)
        kl = jax.random.split(ks[5 + l], 4)
        lstm.append({
            "w_ih": jax.random.normal(kl[0], (in_size, 4 * H), jnp.float32) / jnp.sqrt(float(in_size)),
            "w_hh": jax.random.normal(kl[1], (H, 4 * H), jnp.float32) / jnp.sqrt(float(H)),
            "b_ih": 0.01 * jax.random.normal(kl[2], (1, 4 * H), jnp.float32),
            "b_hh": 0.01 * jax.random.normal(kl[3], (1, 4 * H), jnp.float32),
        })
    params["lstm"] = lstm
    return params


if __name__ == "__main__":
    # config: hidden_size=32, embedding_size=256 (== Sequential Linear output,
    # which feeds the LSTM), nlayers=2, bidirectional=True
    H, E, NLAYERS = 32, 256, 2
    BID = 2
    D = H * BID
    B, S_ENC, S_STY = 2, 8, 8

    key = jax.random.PRNGKey(0)
    k_emb, k_h, k_c, k_enc, k_sty = jax.random.split(key, 5)
    input_embeds = jax.random.normal(k_emb, (B, 1, E), jnp.float32)
    h0 = jax.random.normal(k_h, (NLAYERS, B, H), jnp.float32)
    c0 = jax.random.normal(k_c, (NLAYERS, B, H), jnp.float32)
    enc_outs = jax.random.normal(k_enc, (B, S_ENC, D), jnp.float32)
    style_features = jax.random.normal(k_sty, (B, S_STY, D), jnp.float32)
    lengths = jnp.array([S_ENC, 5], jnp.int32)
    attention_mask = jnp.arange(S_ENC)[None, :] >= lengths[:, None]   # (B, S_ENC) bool

    params = init_params(jax.random.PRNGKey(42), H, D, E, NLAYERS)

    out, (h1, c1), aw = decoder_forward(
        params, input_embeds, (h0, c0), enc_outs, attention_mask, style_features)
    jax.block_until_ready((out, h1, c1, aw))

    r_out, (r_h, r_c), r_aw = reference_forward(
        params, input_embeds, (h0, c0), enc_outs, attention_mask, style_features)

    assert out.shape == (B, H) and h1.shape == (NLAYERS, B, H) and aw.shape == (B, 1, S_ENC)
    assert jnp.allclose(out, r_out, rtol=1e-3, atol=1e-3)
    assert jnp.allclose(h1, r_h, rtol=1e-3, atol=1e-3)
    assert jnp.allclose(c1, r_c, rtol=1e-3, atol=1e-3)
    assert jnp.allclose(aw, r_aw, rtol=1e-3, atol=1e-3)
    print("KERNEL_OK")
</pallas_src>

<mosaic_0001>
module attributes {stable_mosaic.version = 11 : i64} {
  func.func @_precompute_kernel(%arg0: memref<2x8x64xf32, #tpu.memory_space<vmem>>, %arg1: memref<2x8x64xf32, #tpu.memory_space<vmem>>, %arg2: memref<64x64xf32, #tpu.memory_space<vmem>>, %arg3: memref<64x64xf32, #tpu.memory_space<vmem>>, %arg4: memref<1x64xf32, #tpu.memory_space<vmem>>, %arg5: memref<64x64xf32, #tpu.memory_space<vmem>>, %arg6: memref<2x8x64xf32, #tpu.memory_space<vmem>>, %arg7: memref<2x8x64xf32, #tpu.memory_space<vmem>>, %arg8: memref<2x8x64xf32, #tpu.memory_space<vmem>>) attributes {dimension_semantics = [], scalar_prefetch = 0 : i64, scratch_operands = 0 : i64, tpu.core_type = #tpu.core_type<tc>} {
    %c0 = arith.constant 0 : index
    %c0_0 = arith.constant 0 : index
    %c0_1 = arith.constant 0 : index
    %0 = vector.load %arg0[%c0, %c0_0, %c0_1] : memref<2x8x64xf32, #tpu.memory_space<vmem>>, vector<2x8x64xf32>
    %1 = vector.shape_cast %0 : vector<2x8x64xf32> to vector<16x64xf32>
    %c0_2 = arith.constant 0 : index
    %c0_3 = arith.constant 0 : index
    %2 = vector.load %arg2[%c0_2, %c0_3] : memref<64x64xf32, #tpu.memory_space<vmem>>, vector<64x64xf32>
    %cst = arith.constant dense<0.000000e+00> : vector<16x64xf32>
    %3 = tpu.matmul %1, %2, %cst {dimension_numbers = #tpu.dot_dimension_numbers<[1], [0], [0], [1], [0, 0, 1, 1], [], []>} : vector<16x64xf32>, vector<64x64xf32>, vector<16x64xf32> -> vector<16x64xf32>
    %4 = vector.shape_cast %3 : vector<16x64xf32> to vector<2x8x64xf32>
    %c0_4 = arith.constant 0 : index
    %c0_5 = arith.constant 0 : index
    %c0_6 = arith.constant 0 : index
    %5 = vector.load %arg6[%c0_4, %c0_5, %c0_6] : memref<2x8x64xf32, #tpu.memory_space<vmem>>, vector<2x8x64xf32>
    tpu.vector_store %arg6[%c0_4, %c0_5, %c0_6], %4 {strides = array<i32>} : memref<2x8x64xf32, #tpu.memory_space<vmem>>, vector<2x8x64xf32>,
    %c0_7 = arith.constant 0 : index
    %c0_8 = arith.constant 0 : index
    %c0_9 = arith.constant 0 : index
    %6 = vector.load %arg1[%c0_7, %c0_8, %c0_9] : memref<2x8x64xf32, #tpu.memory_space<vmem>>, vector<2x8x64xf32>
    %7 = vector.shape_cast %6 : vector<2x8x64xf32> to vector<16x64xf32>
    %c0_10 = arith.constant 0 : index
    %c0_11 = arith.constant 0 : index
    %8 = vector.load %arg3[%c0_10, %c0_11] : memref<64x64xf32, #tpu.memory_space<vmem>>, vector<64x64xf32>
    %cst_12 = arith.constant dense<0.000000e+00> : vector<16x64xf32>
    %9 = tpu.matmul %7, %8, %cst_12 {dimension_numbers = #tpu.dot_dimension_numbers<[1], [0], [0], [1], [0, 0, 1, 1], [], []>} : vector<16x64xf32>, vector<64x64xf32>, vector<16x64xf32> -> vector<16x64xf32>
    %c0_13 = arith.constant 0 : index
    %c0_14 = arith.constant 0 : index
    %10 = vector.load %arg4[%c0_13, %c0_14] : memref<1x64xf32, #tpu.memory_space<vmem>>, vector<1x64xf32>
    %11 = vector.broadcast %10 : vector<1x64xf32> to vector<16x64xf32>
    %12 = arith.addf %9, %11 : vector<16x64xf32>
    %13 = vector.shape_cast %12 : vector<16x64xf32> to vector<2x8x64xf32>
    %c0_15 = arith.constant 0 : index
    %c0_16 = arith.constant 0 : index
    %c0_17 = arith.constant 0 : index
    %14 = vector.load %arg7[%c0_15, %c0_16, %c0_17] : memref<2x8x64xf32, #tpu.memory_space<vmem>>, vector<2x8x64xf32>
    tpu.vector_store %arg7[%c0_15, %c0_16, %c0_17], %13 {strides = array<i32>} : memref<2x8x64xf32, #tpu.memory_space<vmem>>, vector<2x8x64xf32>,
    %c0_18 = arith.constant 0 : index
    %c0_19 = arith.constant 0 : index
    %15 = vector.load %arg5[%c0_18, %c0_19] : memref<64x64xf32, #tpu.memory_space<vmem>>, vector<64x64xf32>
    %cst_20 = arith.constant dense<0.000000e+00> : vector<16x64xf32>
    %16 = tpu.matmul %12, %15, %cst_20 {dimension_numbers = #tpu.dot_dimension_numbers<[1], [0], [0], [1], [0, 0, 1, 1], [], []>} : vector<16x64xf32>, vector<64x64xf32>, vector<16x64xf32> -> vector<16x64xf32>
    %17 = vector.shape_cast %16 : vector<16x64xf32> to vector<2x8x64xf32>
    %c0_21 = arith.constant 0 : index
    %c0_22 = arith.constant 0 : index
    %c0_23 = arith.constant 0 : index
    %18 = vector.load %arg8[%c0_21, %c0_22, %c0_23] : memref<2x8x64xf32, #tpu.memory_space<vmem>>, vector<2x8x64xf32>
    tpu.vector_store %arg8[%c0_21, %c0_22, %c0_23], %17 {strides = array<i32>} : memref<2x8x64xf32, #tpu.memory_space<vmem>>, vector<2x8x64xf32>,
    return
  }
}

</mosaic_0001>

<bundles_post_ra>
// kernel: tpu_custom_call.1
= control target key start
LH: loop header
LB: loop body
LE: loop exit
PB: predicated region body
PF: predicated region fallthrough
CT: control target
= control target key end

     0   :  { %14 = vsyncpa [#allocation3], 0  ;;  %s973_s0 = inlined_call_operand.hbm [shape: f32[2,8,64], index: 0, kind: input, shape index: {}]   ;;  %s974_s1 = inlined_call_operand.hbm [shape: f32[2,8,64], index: 1, kind: input, shape index: {}]   ;;  %s975_s2 = inlined_call_operand.hbm [shape: f32[64,64], index: 2, kind: input, shape index: {}]   ;;  %s976_s3 = inlined_call_operand.hbm [shape: f32[64,64], index: 3, kind: input, shape index: {}]   ;;  %s977_s4 = inlined_call_operand.vmem [shape: f32[1,64], index: 4, kind: input, shape index: {}]   ;;  %s978_s5 = inlined_call_operand.hbm [shape: f32[64,64], index: 5, kind: input, shape index: {}]   ;;  %s979_s6 = inlined_call_operand.hbm [shape: f32[2,8,64], index: 6, kind: output, shape index: {0}]   ;;  %s980_s7 = inlined_call_operand.hbm [shape: f32[2,8,64], index: 7, kind: output, shape index: {1}]   ;;  %s981_s8 = inlined_call_operand.hbm [shape: f32[2,8,64], index: 8, kind: output, shape index: {2}]  }
   0x1   :  { %15 = vsyncpa [#allocation6], 0 }
   0x2   :  { %16 = vsyncpa [#allocation9], 0 }
   0x3   :  { %17 = vsyncpa [#allocation4], 0 }
   0x4   :  { %18 = vsyncpa [#allocation13], 0  ;;  %s769_s27 = smov [#allocation5]   ;;  %s770_s29 = smov [#allocation8]  }
   0x5   :  { %s36_s28 = sshll.u32 %s769_s27, 4  ;;  %s60_s30 = sshll.u32 %s770_s29, 4  ;;  %s37_s28 = int_to_ptr.vmem [resolvable:$true] %s36_s28  ;;  %s824_s30 = int_to_ptr.vmem [resolvable:$true] %s60_s30 }
   0x6   :  { %s583_s11 = scalar_lea.hbm %s974_s1, 256 }
   0x7   :  { %p584_p0 = scmp.ne.s32.totalorder %s974_s1, %s583_s11  ;;  %p587_p1 = scmp.lt.u32.totalorder %s583_s11, %s974_s1 }
   0x9   :  { %p589_p2 = pnand %p587_p1, %p584_p0 }
   0xb   :  { %592 = shalt.err (!%p589_p2)
}
   0xc   :  { %s593_s16 = scalar_lea.vmem %s37_s28, 256  ;;  %p598_p4 = scmp.lt.s32.totalorder %s37_s28, %s37_s28 }
   0xd   :  { %p594_p3 = scmp.ne.s32.totalorder %s37_s28, %s593_s16  ;;  %p599_p5 = scmp.lt.s32.totalorder %s593_s16, %s593_s16 }
   0xf   :  { %p600_p6 = por %p599_p5, %p598_p4 }
  0x11   :  { %p601_p7 = pnand %p600_p6, %p594_p3 }
  0x13   :  { %604 = shalt.err (!%p601_p7)
}
  0x14   :  { %s771_s17 = smov 128   ;;  %s772_s18 = smov 8  }
  0x15   :  { %42 = dma.hbm_to_vmem [thread:$0]  %s974_s1, 256, %s37_s28, [#allocation6], %s771_s17, %s771_s17, %s772_s18  }
  0x16   :  { %s605_s23 = scalar_lea.hbm %s976_s3, 1024 }
  0x17   :  { %p606_p8 = scmp.ne.s32.totalorder %s976_s3, %s605_s23  ;;  %p609_p9 = scmp.lt.u32.totalorder %s605_s23, %s976_s3 }
  0x19   :  { %p611_p10 = pnand %p609_p9, %p606_p8 }
  0x1b   :  { %614 = shalt.err (!%p611_p10)
}
  0x1c   :  { %s615_s29 = scalar_lea.vmem %s824_s30, 1024  ;;  %p620_p12 = scmp.lt.s32.totalorder %s824_s30, %s824_s30 }
  0x1d   :  { %p616_p11 = scmp.ne.s32.totalorder %s824_s30, %s615_s29  ;;  %p621_p13 = scmp.lt.s32.totalorder %s615_s29, %s615_s29 }
  0x1f   :  { %p622_p0 = por %p621_p13, %p620_p12 }
  0x21   :  { %p623_p1 = pnand %p622_p0, %p616_p11 }
  0x23   :  { %626 = shalt.err (!%p623_p1)
}
  0x24   :  { %66 = dma.hbm_to_vmem [thread:$0]  %s976_s3, 1024, %s824_s30, [#allocation9], %s771_s17, %s771_s17, %s772_s18  }
  0x25   :  { %s773_s9 = smov [#allocation2]   ;;  %s774_s11 = smov [#allocation7]  }
  0x26   :  { %s24_s10 = sshll.u32 %s773_s9, 4  ;;  %s48_s12 = sshll.u32 %s774_s11, 4  ;;  %s25_s10 = int_to_ptr.vmem [resolvable:$true] %s24_s10  ;;  %s861_s12 = int_to_ptr.vmem [resolvable:$true] %s48_s12 }
  0x27   :  { %s627_s15 = scalar_lea.hbm %s973_s0, 256 }
  0x28   :  { %p628_p2 = scmp.ne.s32.totalorder %s973_s0, %s627_s15  ;;  %p631_p3 = scmp.lt.u32.totalorder %s627_s15, %s973_s0 }
  0x2a   :  { %p633_p4 = pnand %p631_p3, %p628_p2 }
  0x2c   :  { %636 = shalt.err (!%p633_p4)
}
  0x2d   :  { %s637_s3 = scalar_lea.vmem %s25_s10, 256  ;;  %p642_p6 = scmp.lt.s32.totalorder %s25_s10, %s25_s10 }
  0x2e   :  { %p638_p5 = scmp.ne.s32.totalorder %s25_s10, %s637_s3  ;;  %p643_p7 = scmp.lt.s32.totalorder %s637_s3, %s637_s3 }
  0x30   :  { %p644_p8 = por %p643_p7, %p642_p6 }
  0x32   :  { %p645_p9 = pnand %p644_p8, %p638_p5 }
  0x34   :  { %648 = shalt.err (!%p645_p9)
}
  0x35   :  { %30 = dma.hbm_to_vmem [thread:$0]  %s973_s0, 256, %s25_s10, [#allocation3], %s771_s17, %s771_s17, %s772_s18  }
  0x36   :  { %s649_s25 = scalar_lea.hbm %s975_s2, 1024 }
  0x37   :  { %p650_p10 = scmp.ne.s32.totalorder %s975_s2, %s649_s25  ;;  %p653_p11 = scmp.lt.u32.totalorder %s649_s25, %s975_s2 }
  0x39   :  { %p655_p12 = pnand %p653_p11, %p650_p10 }
  0x3b   :  { %658 = shalt.err (!%p655_p12)
}
  0x3c   :  { %s659_s28 = scalar_lea.vmem %s861_s12, 1024  ;;  %p664_p0 = scmp.lt.s32.totalorder %s861_s12, %s861_s12 }
  0x3d   :  { %p660_p13 = scmp.ne.s32.totalorder %s861_s12, %s659_s28  ;;  %p665_p1 = scmp.lt.s32.totalorder %s659_s28, %s659_s28 }
  0x3f   :  { %p666_p2 = por %p665_p1, %p664_p0 }
  0x41   :  { %p667_p3 = pnand %p666_p2, %p660_p13 }
  0x43   :  { %670 = shalt.err (!%p667_p3)
}
  0x44   :  { %54 = dma.hbm_to_vmem [thread:$0]  %s975_s2, 1024, %s861_s12, [#allocation6], %s771_s17, %s771_s17, %s772_s18  }
  0x45   :  { %s775_s10 = smov [#allocation10]   ;;  %s671_s15 = scalar_lea.hbm %s978_s5, 1024 }
  0x46   :  { %s74_s11 = sshll.u32 %s775_s10, 4  ;;  %p672_p4 = scmp.ne.s32.totalorder %s978_s5, %s671_s15  ;;  %s75_s11 = int_to_ptr.vmem [resolvable:$true] %s74_s11 }
  0x47   :  { %p675_p5 = scmp.lt.u32.totalorder %s671_s15, %s978_s5 }
  0x49   :  { %p677_p6 = pnand %p675_p5, %p672_p4 }
  0x4b   :  { %680 = shalt.err (!%p677_p6)
}
  0x4c   :  { %s681_s3 = scalar_lea.vmem %s75_s11, 1024  ;;  %p686_p8 = scmp.lt.s32.totalorder %s75_s11, %s75_s11 }
  0x4d   :  { %p682_p7 = scmp.ne.s32.totalorder %s75_s11, %s681_s3  ;;  %p687_p9 = scmp.lt.s32.totalorder %s681_s3, %s681_s3 }
  0x4f   :  { %p688_p10 = por %p687_p9, %p686_p8 }
  0x51   :  { %p689_p11 = pnand %p688_p10, %p682_p7 }
  0x53   :  { %692 = shalt.err (!%p689_p11)
}
  0x54   :  { %80 = dma.hbm_to_vmem [thread:$0]  %s978_s5, 1024, %s75_s11, [#allocation9], %s771_s17, %s771_s17, %s772_s18  }
  0x55   :  { %759 = dma.done.wait [#allocation3], 256  }
  0x56   :  { %760 = vsyncadd [#allocation3], 4294967040 }
  0x57   :  { %761 = dma.done.wait [#allocation6], 1280  }
  0x58   :  { %762 = vsyncadd [#allocation6], 4294966016 }
  0x59   :  { %763 = dma.done.wait [#allocation9], 2048  }
  0x5a   :  { %764 = vsyncadd [#allocation9], 4294965248  ;;  %v192_v0 = vld [vmem:[#allocation8] sm:$0xff]  ;;  %v193_v1 = vld [vmem:[#allocation8 + $0x8] sm:$0xff]  ;;  %vm106_vm0 = vcmask 523264   ;;  %s776_s22 = smov [#allocation12]  }
  0x5b   :  { %v194_v2 = vld [vmem:[#allocation8 + $0x10] sm:$0xff]  ;;  %v541_v3 = vpack.c.bf16 %v193_v1, %v192_v0  ;;  %v195_v4 = vld [vmem:[#allocation8 + $0x18] sm:$0xff]  ;;  %v196_v6 = vld [vmem:[#allocation8 + $0x20] sm:$0xff]  ;;  %s777_s23 = smov [#allocation11]  }
  0x5c   :  { %v545_v5 = vpack.c.bf16 %v195_v4, %v194_v2  ;;  %v197_v7 = vld [vmem:[#allocation8 + $0x28] sm:$0xff]  ;;  %v190_v8 = vld [vmem:[#allocation5] sm:$0xff]  ;;  %v98_v9 = vld [vmem:[#allocation7] sm:$0xff]  ;;  %s386_s24 = sshll.u32 %s777_s23, 4  ;;  %s387_s24 = int_to_ptr.vmem [resolvable:$true] %s386_s24 }
  0x5d   :  { %542 = vmatprep.subr.bf16.mxu1 %v541_v3  ;;  %503 = vmatprep.mubr.msk.f32.mxu1 %vm106_vm0, %v190_v8  ;;  %v99_v10 = vld [vmem:[#allocation7 + $0x8] sm:$0xff]  ;;  %v100_v12 = vld [vmem:[#allocation7 + $0x10] sm:$0xff]  ;;  %v101_v13 = vld [vmem:[#allocation7 + $0x18] sm:$0xff]  ;;  %v549_v14 = vpack.c.bf16 %v197_v7, %v196_v6 }
  0x5e   :  { %544 = vmatpush3.bf16.msra.mxu1 %v541_v3  ;;  %v525_v11 = vpack.c.bf16 %v99_v10, %v98_v9  ;;  %v529_v15 = vpack.c.bf16 %v101_v13, %v100_v12  ;;  %v102_v16 = vld [vmem:[#allocation7 + $0x20] sm:$0xff]  ;;  %v103_v17 = vld [vmem:[#allocation7 + $0x28] sm:$0xff]  ;;  %v198_v18 = vld [vmem:[#allocation8 + $0x30] sm:$0xff] }
  0x5f   :  { %546 = vmatprep.subr.bf16.mxu1 %v545_v5  ;;  %v199_v19 = vld [vmem:[#allocation8 + $0x38] sm:$0xff]  ;;  %v96_v20 = vld [vmem:[#allocation2] sm:$0xff]  ;;  %v533_v21 = vpack.c.bf16 %v103_v17, %v102_v16  ;;  %v104_v23 = vld [vmem:[#allocation7 + $0x30] sm:$0xff] }
  0x60   :  { %526 = vmatprep.subr.bf16.mxu0 %v525_v11  ;;  %484 = vmatprep.mubr.msk.f32.mxu0 %vm106_vm0, %v96_v20  ;;  %v553_v22 = vpack.c.bf16 %v199_v19, %v198_v18  ;;  %v105_v24 = vld [vmem:[#allocation7 + $0x38] sm:$0xff]  ;;  %v290_v26 = vld [vmem:[#allocation10] sm:$0xff]  ;;  %v291_v27 = vld [vmem:[#allocation10 + $0x8] sm:$0xff] }
  0x61   :  { %528 = vmatpush3.bf16.msra.mxu0 %v525_v11  ;;  %v537_v25 = vpack.c.bf16 %v105_v24, %v104_v23  ;;  %v191_v28 = vld [vmem:[#allocation5 + $0x8] sm:$0xff]  ;;  %v557_v29 = vpack.c.bf16 %v291_v27, %v290_v26  ;;  %v292_v30 = vld [vmem:[#allocation10 + $0x10] sm:$0xff]  ;;  %v97_v32 = vld [vmem:[#allocation2 + $0x8] sm:$0xff] }
  0x62   :  { %548 = vmatpush3.bf16.msra.mxu1 %v545_v5  ;;  %530 = vmatprep.subr.bf16.mxu0 %v529_v15  ;;  %v293_v31 = vld [vmem:[#allocation10 + $0x18] sm:$0xff]  ;;  %v294_v34 = vld [vmem:[#allocation10 + $0x20] sm:$0xff]  ;;  %v295_v35 = vld [vmem:[#allocation10 + $0x28] sm:$0xff] }
  0x63   :  { %550 = vmatprep.subr.bf16.mxu1 %v549_v14  ;;  %v561_v33 = vpack.c.bf16 %v293_v31, %v292_v30  ;;  %v565_v36 = vpack.c.bf16 %v295_v35, %v294_v34  ;;  %v296_v37 = vld [vmem:[#allocation10 + $0x30] sm:$0xff]  ;;  %v297_v38 = vld [vmem:[#allocation10 + $0x38] sm:$0xff]  ;;  %v433_v40 = vld [vmem:[%s977_s4] ss:$0 sm:$0xff]  ;;  %s398_s4 = sshll.u32 %s776_s22, 4  ;;  %s399_s4 = int_to_ptr.vmem [resolvable:$true] %s398_s4 }
  0x64   :  { %v569_v39 = vpack.c.bf16 %v297_v38, %v296_v37  ;;  %s693_s25 = scalar_lea.vmem %s399_s4, 256  ;;  %p698_p13 = scmp.lt.s32.totalorder %s399_s4, %s399_s4 }
  0x65   :  { %532 = vmatpush3.bf16.msra.mxu0 %v529_v15  ;;  %p694_p12 = scmp.ne.s32.totalorder %s399_s4, %s693_s25  ;;  %p699_p0 = scmp.lt.s32.totalorder %s693_s25, %s693_s25 }
  0x66   :  { %552 = vmatpush3.bf16.msra.mxu1 %v549_v14  ;;  %534 = vmatprep.subr.bf16.mxu0 %v533_v21 }
  0x67   :  { %554 = vmatprep.subr.bf16.mxu1 %v553_v22  ;;  %p700_p1 = por %p699_p0, %p698_p13 }
  0x69   :  { %536 = vmatpush3.bf16.msra.mxu0 %v533_v21  ;;  %p701_p2 = pnand %p700_p1, %p694_p12 }
  0x6a   :  { %556 = vmatpush3.bf16.msra.mxu1 %v553_v22  ;;  %538 = vmatprep.subr.bf16.mxu0 %v537_v25 }
  0x6d   :  { %504 = vmatmul.mubr.msk.f32.vlgmr.msra.gmra.mrb[0].mxu1 %vm106_vm0, %v191_v28  ;;  %540 = vmatpush3.bf16.msra.mxu0 %v537_v25 }
  0x6e   :  { %558 = vmatprep.subr.bf16.mxu0 %v557_v29 }
  0x70   :  { %485 = vmatmul.mubr.msk.f32.vlgmr.msra.gmra.mrb[0].mxu0 %vm106_vm0, %v97_v32 }
  0x71   :  { %560 = vmatpush3.bf16.msra.mxu0 %v557_v29 }
  0x72   :  { %562 = vmatprep.subr.bf16.mxu0 %v561_v33 }
  0x75   :  { %564 = vmatpush3.bf16.msra.mxu0 %v561_v33 }
  0x76   :  { %566 = vmatprep.subr.bf16.mxu0 %v565_v36 }
  0x79   :  { %568 = vmatpush3.bf16.msra.mxu0 %v565_v36 }
  0x7a   :  { %570 = vmatprep.subr.bf16.mxu0 %v569_v39 }
  0x7d   :  { %572 = vmatpush3.bf16.msra.mxu0 %v569_v39 }
 0x140   :  { %v505_v41 = vpop.f32.mrb[0].mxu1 }
 0x141   :  { %v285_v42 = vadd.f32 %v505_v41, %v433_v40  ;;  %v279_v43 = vpop.f32.mrb[1].mxu1 }
 0x142   :  { %v280_v44 = vadd.f32 %v433_v40, %v279_v43 }
 0x143   :  { %289 = vst.msk [vmem:[#allocation12 + $0x8] sm:$0xff] %vm106_vm0, %v285_v42  ;;  %v486_v45 = vpop.f32.mrb[0].mxu0 }
 0x144   :  { %288 = vst.msk [vmem:[#allocation12] sm:$0xff] %vm106_vm0, %v280_v44  ;;  %522 = vmatprep.mubr.msk.f32.mxu0 %vm106_vm0, %v280_v44  ;;  %189 = vst.msk [vmem:[#allocation11 + $0x8] sm:$0xff] %vm106_vm0, %v486_v45  ;;  %v179_v46 = vpop.f32.mrb[1].mxu0 }
 0x145   :  { %523 = vmatmul.mubr.msk.f32.vlgmr.msra.gmra.mrb[2].mxu0 %vm106_vm0, %v285_v42  ;;  %188 = vst.msk [vmem:[#allocation11] sm:$0xff] %vm106_vm0, %v179_v46 }
 0x146   :  { %704 = shalt.err (!%p701_p2)
}
 0x147   :  { %s705_s29 = scalar_lea.hbm %s980_s7, 256 }
 0x148   :  { %p706_p3 = scmp.ne.s32.totalorder %s980_s7, %s705_s29  ;;  %p709_p4 = scmp.lt.u32.totalorder %s705_s29, %s980_s7 }
 0x14a   :  { %p711_p5 = pnand %p709_p4, %p706_p3 }
 0x14c   :  { %714 = shalt.err (!%p711_p5)
}
 0x14d   :  { %404 = dma.vmem_to_hbm [thread:$0]  %s399_s4, 256, %s980_s7, [#allocation13], %s771_s17, %s771_s17, %s772_s18  }
 0x14e   :  { %s715_s13 = scalar_lea.vmem %s387_s24, 256  ;;  %p720_p7 = scmp.lt.s32.totalorder %s387_s24, %s387_s24 }
 0x14f   :  { %p716_p6 = scmp.ne.s32.totalorder %s387_s24, %s715_s13  ;;  %p721_p8 = scmp.lt.s32.totalorder %s715_s13, %s715_s13 }
 0x151   :  { %p722_p9 = por %p721_p8, %p720_p7 }
 0x153   :  { %p723_p10 = pnand %p722_p9, %p716_p6 }
 0x155   :  { %726 = shalt.err (!%p723_p10)
}
 0x156   :  { %s727_s16 = scalar_lea.hbm %s979_s6, 256 }
 0x157   :  { %p728_p11 = scmp.ne.s32.totalorder %s979_s6, %s727_s16  ;;  %p731_p12 = scmp.lt.u32.totalorder %s727_s16, %s979_s6 }
 0x159   :  { %p733_p13 = pnand %p731_p12, %p728_p11 }
 0x15b   :  { %736 = shalt.err (!%p733_p13)
}
 0x15c   :  { %392 = dma.vmem_to_hbm [thread:$0]  %s387_s24, 256, %s979_s6, [#allocation4], %s771_s17, %s771_s17, %s772_s18  }
 0x15d   :  { %s778_s12 = smov [#allocation14]  }
 0x15e   :  { %s410_s5 = sshll.u32 %s778_s12, 4  ;;  %s411_s5 = int_to_ptr.vmem [resolvable:$true] %s410_s5 }
 0x15f   :  { %s737_s30 = scalar_lea.vmem %s411_s5, 256  ;;  %p742_p1 = scmp.lt.s32.totalorder %s411_s5, %s411_s5 }
 0x160   :  { %p738_p0 = scmp.ne.s32.totalorder %s411_s5, %s737_s30  ;;  %p743_p2 = scmp.lt.s32.totalorder %s737_s30, %s737_s30 }
 0x162   :  { %p744_p3 = por %p743_p2, %p742_p1 }
 0x164   :  { %p745_p4 = pnand %p744_p3, %p738_p0 }
 0x218   :  { %v524_v47 = vpop.f32.mrb[2].mxu0 }
 0x219   :  { %380 = vst.msk [vmem:[#allocation14 + $0x8] sm:$0xff] %vm106_vm0, %v524_v47  ;;  %v370_v48 = vpop.f32.mrb[3].mxu0 }
 0x21a   :  { %379 = vst.msk [vmem:[#allocation14] sm:$0xff] %vm106_vm0, %v370_v48 }
 0x21b   :  { %748 = shalt.err (!%p745_p4)
}
 0x21c   :  { %s749_s6 = scalar_lea.hbm %s981_s8, 256 }
 0x21d   :  { %p750_p5 = scmp.ne.s32.totalorder %s981_s8, %s749_s6  ;;  %p753_p6 = scmp.lt.u32.totalorder %s749_s6, %s981_s8 }
 0x21f   :  { %p755_p7 = pnand %p753_p6, %p750_p5 }
 0x221   :  { %758 = shalt.err (!%p755_p7)
}
 0x222   :  { %416 = dma.vmem_to_hbm [thread:$0]  %s411_s5, 256, %s981_s8, [#allocation13], %s771_s17, %s771_s17, %s772_s18  }
 0x223   :  { %765 = dma.done.wait [#allocation4], 256  }
 0x224   :  { %766 = vsyncadd [#allocation4], 4294967040 }
 0x225   :  { %767 = dma.done.wait [#allocation13], 512  }
 0x226   :  { %768 = vsyncadd [#allocation13], 4294966784 }
 0x227   :  { %426 = vsyncpa [#allocation3], 1 }
 0x228   :  { %427 = vsyncpa [#allocation6], 1 }
 0x229   :  { %428 = vsyncpa [#allocation9], 1 }
 0x22a   :  { %429 = vsyncpa [#allocation4], 1 }
 0x22b   :  { %430 = vsyncpa [#allocation13], 1 }

</bundles_post_ra>
